<compile_context>
chip_gen: v6e
topology: v6e:2x2x1
jax: 0.10.0
libtpu: 0.0.40
codegen_flags: <defaults>
</compile_context>

<pallas_src>
import math
import functools

import jax
import jax.numpy as jnp
import numpy as np
from jax import lax
from jax.experimental import pallas as pl
from jax.experimental.pallas import tpu as pltpu


def _attention_kernel(x_ref, wqkv_ref, bqkv_ref, ow_ref, ob_ref, o_ref, *,
                      n_heads, d_head):
    S = x_ref.shape[1]
    Hd = n_heads * d_head

    x = x_ref[0]                                                    # (S, d_model)

    # Fused, lane-dense QKV projection: one MXU matmul covers all heads.
    qkv = jnp.dot(x, wqkv_ref[...],
                  preferred_element_type=jnp.float32) + bqkv_ref[...]  # (S, 3*H*dh)

    # Causal mask, built once (hoisted out of the per-head loop).
    row = lax.broadcasted_iota(jnp.int32, (S, S), 0)
    col = lax.broadcasted_iota(jnp.int32, (S, S), 1)
    causal = col > row
    neg = jnp.float32(-100000.0)
    scale = jnp.float32(1.0 / math.sqrt(d_head))

    # Per-head attention on VMEM-resident data (static unroll over heads; the
    # dominant matmuls — QKV and O projections — are already head-fused).
    attn_heads = []
    for h in range(n_heads):
        # Scale q (S, dh) rather than the (S, S) logits: O(S*dh) vs O(S^2) VPU.
        q = qkv[:, h * d_head:(h + 1) * d_head] * scale             # (S, dh)
        k = qkv[:, Hd + h * d_head:Hd + (h + 1) * d_head]           # (S, dh)
        v = qkv[:, 2 * Hd + h * d_head:2 * Hd + (h + 1) * d_head]   # (S, dh)

        # q @ k^T without materializing the transpose.
        logits = lax.dot_general(q, k, (((1,), (1,)), ((), ())),
                                 preferred_element_type=jnp.float32)  # (S, S)
        logits = jnp.where(causal, neg, logits)

        m = jnp.max(logits, axis=-1, keepdims=True)
        e = jnp.exp(logits - m)
        p = e / jnp.sum(e, axis=-1, keepdims=True)

        attn_heads.append(jnp.dot(p, v, preferred_element_type=jnp.float32))

    attn = jnp.concatenate(attn_heads, axis=-1)                     # (S, H*dh)

    # Fused output projection: reduces over heads as the matmul K dimension.
    out = jnp.dot(attn, ow_ref[...],
                  preferred_element_type=jnp.float32) + ob_ref[...]
    o_ref[0] = out.astype(o_ref.dtype)


def attention_block(x, Q_w, Q_b, K_w, K_b, V_w, V_b, O_w, O_b):
    """Causal multi-head attention matching the PyTorch AttentionBlock.forward."""
    B, S, d_model = x.shape
    n_heads, _, d_head = Q_w.shape
    Hd = n_heads * d_head

    # Wrapper-side weight packing (layout plumbing, no extra compute in-kernel).
    def pack(w):  # (H, d_model, dh) -> (d_model, H*dh), head-major columns
        return jnp.transpose(w, (1, 0, 2)).reshape(d_model, Hd)

    W_qkv = jnp.concatenate([pack(Q_w), pack(K_w), pack(V_w)], axis=1)  # (d_model, 3*H*dh)
    b_qkv = jnp.concatenate(
        [Q_b.reshape(Hd), K_b.reshape(Hd), V_b.reshape(Hd)]).reshape(1, 3 * Hd)
    W_o = O_w.reshape(Hd, d_model)                                      # (H*dh, d_model)
    b_o = O_b.reshape(1, d_model)

    kernel = functools.partial(_attention_kernel,
                               n_heads=n_heads, d_head=d_head)

    return pl.pallas_call(
        kernel,
        out_shape=jax.ShapeDtypeStruct((B, S, d_model), x.dtype),
        grid=(B,),
        in_specs=[
            pl.BlockSpec((1, S, d_model), lambda b: (b, 0, 0)),       # x
            pl.BlockSpec((d_model, 3 * Hd), lambda b: (0, 0)),        # W_qkv (resident)
            pl.BlockSpec((1, 3 * Hd), lambda b: (0, 0)),              # b_qkv
            pl.BlockSpec((Hd, d_model), lambda b: (0, 0)),            # W_o (resident)
            pl.BlockSpec((1, d_model), lambda b: (0, 0)),             # b_o
        ],
        out_specs=pl.BlockSpec((1, S, d_model), lambda b: (b, 0, 0)),
        compiler_params=pltpu.CompilerParams(
            dimension_semantics=("parallel",)),
    )(x, W_qkv, b_qkv, W_o, b_o)


def attention_block_ref(x, Q_w, Q_b, K_w, K_b, V_w, V_b, O_w, O_b):
    """Pure-JAX reference reproducing the PyTorch forward exactly."""
    d_head = Q_w.shape[-1]
    q = jnp.einsum('bpm,hmd->bphd', x, Q_w) + Q_b
    k = jnp.einsum('bpm,hmd->bphd', x, K_w) + K_b
    logits = jnp.einsum('bqhd,bkhd->bhqk', q, k) / math.sqrt(d_head)
    s = logits.shape[-1]
    mask = jnp.triu(jnp.ones((s, s), dtype=bool), k=1)
    logits = jnp.where(mask, -100000.0, logits)
    scores = jax.nn.softmax(logits, axis=-1)
    v = jnp.einsum('bpm,hmd->bphd', x, V_w) + V_b
    attn = jnp.einsum('bhqk,bkhd->bqhd', scores, v)
    return jnp.einsum('bqhd,hdm->bqm', attn, O_w) + O_b


def init_params(key, n_heads, d_head, d_model):
    ks = jax.random.split(key, 8)

    def xavier(k, shape, fan_in, fan_out):
        std = math.sqrt(2.0 / (fan_in + fan_out))
        return std * jax.random.normal(k, shape, dtype=jnp.float32)

    # PyTorch _calculate_fan_in_and_fan_out for 3-D (out_f, in_f, rf):
    #   fan_in = shape[1] * prod(shape[2:]), fan_out = shape[0] * prod(shape[2:])
    Q_w = xavier(ks[0], (n_heads, d_model, d_head), d_model * d_head, n_heads * d_head)
    K_w = xavier(ks[1], (n_heads, d_model, d_head), d_model * d_head, n_heads * d_head)
    V_w = xavier(ks[2], (n_heads, d_model, d_head), d_model * d_head, n_heads * d_head)
    O_w = xavier(ks[3], (n_heads, d_head, d_model), d_head * d_model, n_heads * d_model)
    # Biases are torch.empty in the module (uninitialized); use small
    # deterministic values here.
    Q_b = 0.01 * jax.random.normal(ks[4], (n_heads, d_head), dtype=jnp.float32)
    K_b = 0.01 * jax.random.normal(ks[5], (n_heads, d_head), dtype=jnp.float32)
    V_b = 0.01 * jax.random.normal(ks[6], (n_heads, d_head), dtype=jnp.float32)
    O_b = 0.01 * jax.random.normal(ks[7], (d_model,), dtype=jnp.float32)
    return Q_w, Q_b, K_w, K_b, V_w, V_b, O_w, O_b


if __name__ == "__main__":
    batch, seq, n_heads, d_head, d_model = 2, 8, 4, 8, 32

    key = jax.random.PRNGKey(0)
    kx, kp = jax.random.split(key)
    x = jax.random.normal(kx, (batch, seq, d_model), dtype=jnp.float32)
    params = init_params(kp, n_heads, d_head, d_model)

    out = attention_block(x, *params)
    out = jax.block_until_ready(out)

    ref = jax.block_until_ready(attention_block_ref(x, *params))
    np.testing.assert_allclose(np.asarray(out), np.asarray(ref),
                               rtol=1e-5, atol=1e-5)

    print("KERNEL_OK")
</pallas_src>

<mosaic_0001>
module attributes {stable_mosaic.version = 11 : i64} {
  func.func @_attention_kernel(%arg0: i32, %arg1: memref<1x8x32xf32, #tpu.memory_space<vmem>>, %arg2: memref<32x96xf32, #tpu.memory_space<vmem>>, %arg3: memref<1x96xf32, #tpu.memory_space<vmem>>, %arg4: memref<32x32xf32, #tpu.memory_space<vmem>>, %arg5: memref<1x32xf32, #tpu.memory_space<vmem>>, %arg6: memref<1x8x32xf32, #tpu.memory_space<vmem>>) attributes {dimension_semantics = [#tpu.dimension_semantics<parallel>], iteration_bounds = array<i64: 2>, scalar_prefetch = 0 : i64, scratch_operands = 0 : i64, tpu.core_type = #tpu.core_type<tc>, window_params = [{transform_indices = @transform_0, window_bounds = array<i64: 1, 8, 32>}, {pipeline_mode = #tpu.pipeline_mode<synchronous>, transform_indices = @transform_1, window_bounds = array<i64: 32, 96>}, {pipeline_mode = #tpu.pipeline_mode<synchronous>, transform_indices = @transform_2, window_bounds = array<i64: 1, 96>}, {pipeline_mode = #tpu.pipeline_mode<synchronous>, transform_indices = @transform_3, window_bounds = array<i64: 32, 32>}, {pipeline_mode = #tpu.pipeline_mode<synchronous>, transform_indices = @transform_4, window_bounds = array<i64: 1, 32>}, {transform_indices = @transform_5, window_bounds = array<i64: 1, 8, 32>}]} {
    %c0 = arith.constant 0 : index
    %c0_0 = arith.constant 0 : index
    %c0_1 = arith.constant 0 : index
    %0 = vector.load %arg1[%c0, %c0_0, %c0_1] : memref<1x8x32xf32, #tpu.memory_space<vmem>>, vector<1x8x32xf32>
    %1 = vector.shape_cast %0 : vector<1x8x32xf32> to vector<8x32xf32>
    %c0_2 = arith.constant 0 : index
    %c0_3 = arith.constant 0 : index
    %2 = vector.load %arg2[%c0_2, %c0_3] : memref<32x96xf32, #tpu.memory_space<vmem>>, vector<32x96xf32>
    %cst = arith.constant dense<0.000000e+00> : vector<8x96xf32>
    %3 = tpu.matmul %1, %2, %cst {dimension_numbers = #tpu.dot_dimension_numbers<[1], [0], [0], [1], [0, 0, 1, 1], [], []>} : vector<8x32xf32>, vector<32x96xf32>, vector<8x96xf32> -> vector<8x96xf32>
    %c0_4 = arith.constant 0 : index
    %c0_5 = arith.constant 0 : index
    %4 = vector.load %arg3[%c0_4, %c0_5] : memref<1x96xf32, #tpu.memory_space<vmem>>, vector<1x96xf32>
    %5 = vector.broadcast %4 : vector<1x96xf32> to vector<8x96xf32>
    %6 = arith.addf %3, %5 : vector<8x96xf32>
    %7 = tpu.iota {dimensions = array<i32: 0>} : vector<8x8xi32>
    %8 = tpu.iota {dimensions = array<i32: 1>} : vector<8x8xi32>
    %9 = arith.cmpi sgt, %8, %7 : vector<8x8xi32>
    %10 = vector.extract_strided_slice %6 {offsets = [0, 0], sizes = [8, 8], strides = [1, 1]} : vector<8x96xf32> to vector<8x8xf32>
    %cst_6 = arith.constant 0.353553385 : f32
    %11 = vector.broadcast %cst_6 : f32 to vector<8x8xf32>
    %12 = arith.mulf %10, %11 : vector<8x8xf32>
    %13 = vector.extract_strided_slice %6 {offsets = [0, 32], sizes = [8, 8], strides = [1, 1]} : vector<8x96xf32> to vector<8x8xf32>
    %14 = vector.extract_strided_slice %6 {offsets = [0, 64], sizes = [8, 8], strides = [1, 1]} : vector<8x96xf32> to vector<8x8xf32>
    %cst_7 = arith.constant dense<0.000000e+00> : vector<8x8xf32>
    %15 = tpu.matmul %12, %13, %cst_7 {dimension_numbers = #tpu.dot_dimension_numbers<[1], [1], [0], [0], [0, 0, 1, 0], [], []>} : vector<8x8xf32>, vector<8x8xf32>, vector<8x8xf32> -> vector<8x8xf32>
    %cst_8 = arith.constant -1.000000e+05 : f32
    %16 = vector.broadcast %cst_8 : f32 to vector<8x8xf32>
    %17 = arith.select %9, %16, %15 : vector<8x8xi1>, vector<8x8xf32>
    %cst_9 = arith.constant dense<0xFF800000> : vector<8xf32>
    %18 = vector.multi_reduction <maximumf>, %17, %cst_9 [1] : vector<8x8xf32> to vector<8xf32>
    %19 = vector.shape_cast %18 : vector<8xf32> to vector<8x1xf32>
    %20 = vector.broadcast %19 : vector<8x1xf32> to vector<8x8xf32>
    %21 = arith.subf %17, %20 : vector<8x8xf32>
    %22 = math.exp %21 : vector<8x8xf32>
    %cst_10 = arith.constant dense<0.000000e+00> : vector<8xf32>
    %23 = vector.multi_reduction <add>, %22, %cst_10 [1] : vector<8x8xf32> to vector<8xf32>
    %24 = vector.shape_cast %23 : vector<8xf32> to vector<8x1xf32>
    %25 = vector.broadcast %24 : vector<8x1xf32> to vector<8x8xf32>
    %26 = arith.divf %22, %25 : vector<8x8xf32>
    %cst_11 = arith.constant dense<0.000000e+00> : vector<8x8xf32>
    %27 = tpu.matmul %26, %14, %cst_11 {dimension_numbers = #tpu.dot_dimension_numbers<[1], [0], [0], [1], [0, 0, 1, 1], [], []>} : vector<8x8xf32>, vector<8x8xf32>, vector<8x8xf32> -> vector<8x8xf32>
    %28 = vector.extract_strided_slice %6 {offsets = [0, 8], sizes = [8, 8], strides = [1, 1]} : vector<8x96xf32> to vector<8x8xf32>
    %cst_12 = arith.constant 0.353553385 : f32
    %29 = vector.broadcast %cst_12 : f32 to vector<8x8xf32>
    %30 = arith.mulf %28, %29 : vector<8x8xf32>
    %31 = vector.extract_strided_slice %6 {offsets = [0, 40], sizes = [8, 8], strides = [1, 1]} : vector<8x96xf32> to vector<8x8xf32>
    %32 = vector.extract_strided_slice %6 {offsets = [0, 72], sizes = [8, 8], strides = [1, 1]} : vector<8x96xf32> to vector<8x8xf32>
    %cst_13 = arith.constant dense<0.000000e+00> : vector<8x8xf32>
    %33 = tpu.matmul %30, %31, %cst_13 {dimension_numbers = #tpu.dot_dimension_numbers<[1], [1], [0], [0], [0, 0, 1, 0], [], []>} : vector<8x8xf32>, vector<8x8xf32>, vector<8x8xf32> -> vector<8x8xf32>
    %cst_14 = arith.constant -1.000000e+05 : f32
    %34 = vector.broadcast %cst_14 : f32 to vector<8x8xf32>
    %35 = arith.select %9, %34, %33 : vector<8x8xi1>, vector<8x8xf32>
    %cst_15 = arith.constant dense<0xFF800000> : vector<8xf32>
    %36 = vector.multi_reduction <maximumf>, %35, %cst_15 [1] : vector<8x8xf32> to vector<8xf32>
    %37 = vector.shape_cast %36 : vector<8xf32> to vector<8x1xf32>
    %38 = vector.broadcast %37 : vector<8x1xf32> to vector<8x8xf32>
    %39 = arith.subf %35, %38 : vector<8x8xf32>
    %40 = math.exp %39 : vector<8x8xf32>
    %cst_16 = arith.constant dense<0.000000e+00> : vector<8xf32>
    %41 = vector.multi_reduction <add>, %40, %cst_16 [1] : vector<8x8xf32> to vector<8xf32>
    %42 = vector.shape_cast %41 : vector<8xf32> to vector<8x1xf32>
    %43 = vector.broadcast %42 : vector<8x1xf32> to vector<8x8xf32>
    %44 = arith.divf %40, %43 : vector<8x8xf32>
    %cst_17 = arith.constant dense<0.000000e+00> : vector<8x8xf32>
    %45 = tpu.matmul %44, %32, %cst_17 {dimension_numbers = #tpu.dot_dimension_numbers<[1], [0], [0], [1], [0, 0, 1, 1], [], []>} : vector<8x8xf32>, vector<8x8xf32>, vector<8x8xf32> -> vector<8x8xf32>
    %46 = vector.extract_strided_slice %6 {offsets = [0, 16], sizes = [8, 8], strides = [1, 1]} : vector<8x96xf32> to vector<8x8xf32>
    %cst_18 = arith.constant 0.353553385 : f32
    %47 = vector.broadcast %cst_18 : f32 to vector<8x8xf32>
    %48 = arith.mulf %46, %47 : vector<8x8xf32>
    %49 = vector.extract_strided_slice %6 {offsets = [0, 48], sizes = [8, 8], strides = [1, 1]} : vector<8x96xf32> to vector<8x8xf32>
    %50 = vector.extract_strided_slice %6 {offsets = [0, 80], sizes = [8, 8], strides = [1, 1]} : vector<8x96xf32> to vector<8x8xf32>
    %cst_19 = arith.constant dense<0.000000e+00> : vector<8x8xf32>
    %51 = tpu.matmul %48, %49, %cst_19 {dimension_numbers = #tpu.dot_dimension_numbers<[1], [1], [0], [0], [0, 0, 1, 0], [], []>} : vector<8x8xf32>, vector<8x8xf32>, vector<8x8xf32> -> vector<8x8xf32>
    %cst_20 = arith.constant -1.000000e+05 : f32
    %52 = vector.broadcast %cst_20 : f32 to vector<8x8xf32>
    %53 = arith.select %9, %52, %51 : vector<8x8xi1>, vector<8x8xf32>
    %cst_21 = arith.constant dense<0xFF800000> : vector<8xf32>
    %54 = vector.multi_reduction <maximumf>, %53, %cst_21 [1] : vector<8x8xf32> to vector<8xf32>
    %55 = vector.shape_cast %54 : vector<8xf32> to vector<8x1xf32>
    %56 = vector.broadcast %55 : vector<8x1xf32> to vector<8x8xf32>
    %57 = arith.subf %53, %56 : vector<8x8xf32>
    %58 = math.exp %57 : vector<8x8xf32>
    %cst_22 = arith.constant dense<0.000000e+00> : vector<8xf32>
    %59 = vector.multi_reduction <add>, %58, %cst_22 [1] : vector<8x8xf32> to vector<8xf32>
    %60 = vector.shape_cast %59 : vector<8xf32> to vector<8x1xf32>
    %61 = vector.broadcast %60 : vector<8x1xf32> to vector<8x8xf32>
    %62 = arith.divf %58, %61 : vector<8x8xf32>
    %cst_23 = arith.constant dense<0.000000e+00> : vector<8x8xf32>
    %63 = tpu.matmul %62, %50, %cst_23 {dimension_numbers = #tpu.dot_dimension_numbers<[1], [0], [0], [1], [0, 0, 1, 1], [], []>} : vector<8x8xf32>, vector<8x8xf32>, vector<8x8xf32> -> vector<8x8xf32>
    %64 = vector.extract_strided_slice %6 {offsets = [0, 24], sizes = [8, 8], strides = [1, 1]} : vector<8x96xf32> to vector<8x8xf32>
    %cst_24 = arith.constant 0.353553385 : f32
    %65 = vector.broadcast %cst_24 : f32 to vector<8x8xf32>
    %66 = arith.mulf %64, %65 : vector<8x8xf32>
    %67 = vector.extract_strided_slice %6 {offsets = [0, 56], sizes = [8, 8], strides = [1, 1]} : vector<8x96xf32> to vector<8x8xf32>
    %68 = vector.extract_strided_slice %6 {offsets = [0, 88], sizes = [8, 8], strides = [1, 1]} : vector<8x96xf32> to vector<8x8xf32>
    %cst_25 = arith.constant dense<0.000000e+00> : vector<8x8xf32>
    %69 = tpu.matmul %66, %67, %cst_25 {dimension_numbers = #tpu.dot_dimension_numbers<[1], [1], [0], [0], [0, 0, 1, 0], [], []>} : vector<8x8xf32>, vector<8x8xf32>, vector<8x8xf32> -> vector<8x8xf32>
    %cst_26 = arith.constant -1.000000e+05 : f32
    %70 = vector.broadcast %cst_26 : f32 to vector<8x8xf32>
    %71 = arith.select %9, %70, %69 : vector<8x8xi1>, vector<8x8xf32>
    %cst_27 = arith.constant dense<0xFF800000> : vector<8xf32>
    %72 = vector.multi_reduction <maximumf>, %71, %cst_27 [1] : vector<8x8xf32> to vector<8xf32>
    %73 = vector.shape_cast %72 : vector<8xf32> to vector<8x1xf32>
    %74 = vector.broadcast %73 : vector<8x1xf32> to vector<8x8xf32>
    %75 = arith.subf %71, %74 : vector<8x8xf32>
    %76 = math.exp %75 : vector<8x8xf32>
    %cst_28 = arith.constant dense<0.000000e+00> : vector<8xf32>
    %77 = vector.multi_reduction <add>, %76, %cst_28 [1] : vector<8x8xf32> to vector<8xf32>
    %78 = vector.shape_cast %77 : vector<8xf32> to vector<8x1xf32>
    %79 = vector.broadcast %78 : vector<8x1xf32> to vector<8x8xf32>
    %80 = arith.divf %76, %79 : vector<8x8xf32>
    %cst_29 = arith.constant dense<0.000000e+00> : vector<8x8xf32>
    %81 = tpu.matmul %80, %68, %cst_29 {dimension_numbers = #tpu.dot_dimension_numbers<[1], [0], [0], [1], [0, 0, 1, 1], [], []>} : vector<8x8xf32>, vector<8x8xf32>, vector<8x8xf32> -> vector<8x8xf32>
    %82 = tpu.concatenate %27, %45, %63, %81 in 1 : vector<8x8xf32>, vector<8x8xf32>, vector<8x8xf32>, vector<8x8xf32> -> vector<8x32xf32>
    %c0_30 = arith.constant 0 : index
    %c0_31 = arith.constant 0 : index
    %83 = vector.load %arg4[%c0_30, %c0_31] : memref<32x32xf32, #tpu.memory_space<vmem>>, vector<32x32xf32>
    %cst_32 = arith.constant dense<0.000000e+00> : vector<8x32xf32>
    %84 = tpu.matmul %82, %83, %cst_32 {dimension_numbers = #tpu.dot_dimension_numbers<[1], [0], [0], [1], [0, 0, 1, 1], [], []>} : vector<8x32xf32>, vector<32x32xf32>, vector<8x32xf32> -> vector<8x32xf32>
    %c0_33 = arith.constant 0 : index
    %c0_34 = arith.constant 0 : index
    %85 = vector.load %arg5[%c0_33, %c0_34] : memref<1x32xf32, #tpu.memory_space<vmem>>, vector<1x32xf32>
    %86 = vector.broadcast %85 : vector<1x32xf32> to vector<8x32xf32>
    %87 = arith.addf %84, %86 : vector<8x32xf32>
    %c0_35 = arith.constant 0 : index
    %c0_36 = arith.constant 0 : index
    %c0_37 = arith.constant 0 : index
    %88 = vector.load %arg6[%c0_35, %c0_36, %c0_37] : memref<1x8x32xf32, #tpu.memory_space<vmem>>, vector<1x8x32xf32>
    %89 = vector.shape_cast %88 : vector<1x8x32xf32> to vector<8x32xf32>
    %90 = vector.shape_cast %87 : vector<8x32xf32> to vector<1x8x32xf32>
    tpu.vector_store %arg6[%c0_35, %c0_36, %c0_37], %90 {strides = array<i32>} : memref<1x8x32xf32, #tpu.memory_space<vmem>>, vector<1x8x32xf32>,
    return
  }
  func.func @transform_0(%arg0: i32) -> (i32, i32, i32) {
    %c0_i32 = arith.constant 0 : i32
    %c0_i32_0 = arith.constant 0 : i32
    %c0_i32_1 = arith.constant 0 : i32
    return %arg0, %c0_i32, %c0_i32_0 : i32, i32, i32
  }
  func.func @transform_1(%arg0: i32) -> (i32, i32) {
    %c0_i32 = arith.constant 0 : i32
    %c0_i32_0 = arith.constant 0 : i32
    %c0_i32_1 = arith.constant 0 : i32
    return %c0_i32, %c0_i32_0 : i32, i32
  }
  func.func @transform_2(%arg0: i32) -> (i32, i32) {
    %c0_i32 = arith.constant 0 : i32
    %c0_i32_0 = arith.constant 0 : i32
    %c0_i32_1 = arith.constant 0 : i32
    return %c0_i32, %c0_i32_0 : i32, i32
  }
  func.func @transform_3(%arg0: i32) -> (i32, i32) {
    %c0_i32 = arith.constant 0 : i32
    %c0_i32_0 = arith.constant 0 : i32
    %c0_i32_1 = arith.constant 0 : i32
    return %c0_i32, %c0_i32_0 : i32, i32
  }
  func.func @transform_4(%arg0: i32) -> (i32, i32) {
    %c0_i32 = arith.constant 0 : i32
    %c0_i32_0 = arith.constant 0 : i32
    %c0_i32_1 = arith.constant 0 : i32
    return %c0_i32, %c0_i32_0 : i32, i32
  }
  func.func @transform_5(%arg0: i32) -> (i32, i32, i32) {
    %c0_i32 = arith.constant 0 : i32
    %c0_i32_0 = arith.constant 0 : i32
    %c0_i32_1 = arith.constant 0 : i32
    return %arg0, %c0_i32, %c0_i32_0 : i32, i32, i32
  }
}

</mosaic_0001>

<bundles_post_ra>
// kernel: tpu_custom_call.1
= control target key start
LH: loop header
LB: loop body
LE: loop exit
PB: predicated region body
PF: predicated region fallthrough
CT: control target
= control target key end

     0   :  { %10 = vsyncpa [#allocation3], 0  ;;  %s1913_s0 = inlined_call_operand.hbm [shape: f32[2,8,32], index: 0, kind: input, shape index: {}]   ;;  %s1914_s1 = inlined_call_operand.hbm [shape: f32[32,96], index: 1, kind: input, shape index: {}]   ;;  %s1915_s2 = inlined_call_operand.vmem [shape: f32[1,96], index: 2, kind: input, shape index: {}]   ;;  %s1916_s3 = inlined_call_operand.hbm [shape: f32[32,32], index: 3, kind: input, shape index: {}]   ;;  %s1917_s4 = inlined_call_operand.vmem [shape: f32[1,32], index: 4, kind: input, shape index: {}]   ;;  %s1918_s5 = inlined_call_operand.hbm [shape: f32[2,8,32], index: 5, kind: output, shape index: {}]  }
   0x1   :  { %12 = vsyncpa [#allocation3 + $0x1], 0 }
   0x2   :  { %13 = vsyncpa [#allocation6], 0 }
   0x3   :  { %14 = vsyncpa [#allocation4], 0 }
   0x4   :  { %16 = vsyncpa [#allocation4 + $0x1], 0  ;;  %s1654_s18 = smov 0   ;;  %s1656_s19 = smov 0  }
   0x5   :  { %s1658_s20 = smov 0   ;;  %s1660_s21 = smov 0  }
   0x6 LB: > { %s1675_s22 = sadd.s32 4294967295, %s1600_s21   ;;  %s1231_s23 = sadd.s32 4294967294, %s1600_s21   ;;  %s1600_s21 = sphi %s1660_s21, %s1940_s21   ;;  %s1596_s20 = sphi %s1658_s20, %s1939_s20   ;;  %s1592_s19 = sphi %s1656_s19, %s1938_s19   ;;  %s1588_s18 = sphi %s1654_s18, %s1937_s18  }
   0x7   : > { %p42_p0 = scmp.ne.s32.totalorder %s1592_s19, %s1588_s18  ;;  %p1919_p1 = scmp.eq.s32.totalorder %s1675_s22, 0 }
   0x8   : > { %p156_p3 = scmp.eq.s32.totalorder %s1231_s23, 1  ;;  %p1232_p5 = scmp.ge.s32.totalorder %s1600_s21, 1 }
   0x9   : > { %p1684_p4 = por %p1919_p1, %p42_p0  ;;  %p163_p7 = scmp.lt.s32.totalorder %s1600_s21, 3 }
   0xa   : > { %p1689_p6 = por %p156_p3, %p42_p0  ;;  %s1602_s27 = smov [#allocation5]  }
   0xb   : > { %s1923_s24 = scalar_select %p1684_p4, 1, 0 }
   0xc   : > { %s1924_s25 = scalar_select %p1689_p6, 1, 0 }
   0xd   : > { %p1694_p8 = pnand %p1232_p5, %p163_p7  ;;  %s175_s28 = sshll.u32 %s1602_s27, 4  ;;  %s176_s28 = int_to_ptr.vmem [resolvable:$true] %s175_s28 }
   0xe   : > { %s1603_s30 = smov [#allocation7]   ;;  %s1463_s7 = scalar_lea.vmem %s176_s28, 512 }
   0xf   : > { %s1925_s26 = scalar_select %p1694_p8, 1, 0 }
  0x10   : > { %p1363_p9 = pneg %p1694_p8  ;;  %s191_s6 = sshll.u32 %s1603_s30, 4  ;;  %s192_s6 = int_to_ptr.vmem [resolvable:$true] %s191_s6 }
  0x11   : > { %p1464_p13 = scmp.ne.s32.totalorder %s176_s28, %s1463_s7  ;;  %p1471_p5 = scmp.lt.s32.totalorder %s176_s28, %s176_s28 }
  0x12   : > { %p1703_p11 = pnand %p1363_p9, %p1919_p1  ;;  %p1472_p7 = scmp.lt.s32.totalorder %s1463_s7, %s1463_s7 }
  0x14   : > { %p1454_p12 = pneg %p1703_p11  ;;  %p1473_p10 = por %p1472_p7, %p1471_p5 }
  0x16   : > { %p1466_p0 = pnand %p1464_p13, %p1454_p12 }
  0x18   : > { %p1467_p3 = pneg %p1466_p0 }
  0x1a   : > { %p1474_p9 = pnand %p1473_p10, %p1467_p3 }
  0x1c   : > { %1477 = shalt.err (!%p1474_p9)
}
  0x1d   : > { %s1604_s8 = smov 128   ;;  %s1605_s9 = smov 8  }
  0x1e   : > { %1366 = dma.hbm_to_vmem [thread:$0]  (!%p1703_p11), %s1914_s1, 512, %s176_s28, [#allocation6], %s1604_s8, %s1604_s8, %s1605_s9  }
  0x1f   : > { %s1489_s12 = scalar_lea.vmem %s192_s6, 512  ;;  %p1497_p2 = scmp.lt.s32.totalorder %s192_s6, %s192_s6 }
  0x20   : > { %p1490_p1 = scmp.ne.s32.totalorder %s192_s6, %s1489_s12  ;;  %p1498_p6 = scmp.lt.s32.totalorder %s1489_s12, %s1489_s12 }
  0x22   : > { %p1492_p13 = pnand %p1490_p1, %p1454_p12  ;;  %p1499_p5 = por %p1498_p6, %p1497_p2 }
  0x24   : > { %p1493_p0 = pneg %p1492_p13 }
  0x26   : > { %p1500_p10 = pnand %p1499_p5, %p1493_p0 }
  0x28   : > { %1503 = shalt.err (!%p1500_p10)
}
  0x29   : > { %1369 = dma.hbm_to_vmem [thread:$0]  (!%p1703_p11), %s1916_s3, 512, %s192_s6, [#allocation6], %s1604_s8, %s1604_s8, %s1605_s9  }
  0x2a   : > { %s1726_s15 = sadd.s32 1, %s1600_s21   ;;  %s29_s16 = sadd.s32 1, %s1596_s20 }
  0x2b   : > { %s26_s17 = ssub.s32 %s1600_s21, %s1726_s15  ;;  %p36_p1 = scmp.ne.s32.totalorder %s1596_s20, %s1592_s19 }
  0x2c   : > { %p27_p2 = scmp.eq.s32.totalorder %s26_s17, 0  ;;  %p37_p6 = scmp.eq.s32.totalorder %s1600_s21, 0 }
  0x2d   : > { %p1927_p12 = scmp.eq.s32.totalorder %s1675_s22, 1  ;;  %p1380_p7 = scmp.lt.s32.totalorder %s1600_s21, 2 }
  0x2e   : > { %s1742_s27 = scalar_select %p27_p2, %s1596_s20, %s29_s16  }
  0x2f   : > { %p1736_p3 = por %p1927_p12, %p36_p1  ;;  %p38_p9 = por %p37_p6, %p36_p1 }
  0x30   : > { %s208_s28 = sand.u32 1, %s1596_s20   ;;  %s1237_s30 = sshll.u32 %s1600_s21, 7 }
  0x31   : > { %s1928_s23 = scalar_select %p1736_p3, 1, 0 }
  0x32   : > { %s1236_s29 = sshll.u32 %s208_s28, 3  ;;  %s1749_s8 = scalar_lea.hbm %s1913_s0, %s1237_s30 }
  0x33   : > { %s212_s9 = scalar_lea.vmem [#allocation2], %s1236_s29  ;;  %p1751_p11 = pnand %p1380_p7, %p38_p9 }
  0x34   : > { %s219_s10 = sshll.u32 %s212_s9, 4  ;;  %s209_s12 = scalar_lea.sflag [#allocation3], %s208_s28  ;;  %s220_s10 = int_to_ptr.vmem [resolvable:$true] %s219_s10 }
  0x35   : > { %s1504_s13 = scalar_lea.hbm %s1749_s8, 128  ;;  %p1506_p0 = pneg %p1751_p11 }
  0x36   : > { %p1505_p13 = scmp.ne.s32.totalorder %s1749_s8, %s1504_s13  ;;  %s1509_s17 = scalar_lea.hbm %s1913_s0, 256 }
  0x37   : > { %p1510_p1 = scmp.lt.s32.totalorder %s1749_s8, %s1913_s0  ;;  %p1511_p2 = scmp.lt.s32.totalorder %s1509_s17, %s1504_s13 }
  0x38   : > { %p1507_p5 = pnand %p1506_p0, %p1505_p13 }
  0x39   : > { %p1512_p6 = por %p1511_p2, %p1510_p1 }
  0x3a   : > { %p1508_p10 = pneg %p1507_p5 }
  0x3c   : > { %p1513_p12 = pnand %p1512_p6, %p1508_p10 }
  0x3e   : > { %1516 = shalt.err (!%p1513_p12)
}
  0x3f   : > { %s1517_s6 = scalar_lea.vmem %s220_s10, 128  ;;  %s1606_s28 = smov [#allocation2]  }
  0x40   : > { %p1518_p7 = scmp.ne.s32.totalorder %s220_s10, %s1517_s6  ;;  %s1522_s7 = sshll.u32 %s1606_s28, 4  ;;  %s1523_s7 = int_to_ptr.vmem [resolvable:$false] %s1522_s7 }
  0x41   : > { %s1524_s9 = scalar_lea.vmem %s1523_s7, 256  ;;  %p1525_p13 = scmp.lt.s32.totalorder %s220_s10, %s1523_s7 }
  0x42   : > { %p1520_p9 = pnand %p1518_p7, %p1506_p0  ;;  %p1526_p5 = scmp.lt.s32.totalorder %s1524_s9, %s1517_s6 }
  0x44   : > { %p1521_p3 = pneg %p1520_p9  ;;  %p1527_p4 = por %p1526_p5, %p1525_p13 }
  0x46   : > { %p1528_p8 = pnand %p1527_p4, %p1521_p3 }
  0x48   : > { %1531 = shalt.err (!%p1528_p8)
}
  0x49   : > { %1373 = dma.hbm_to_vmem [thread:$0]  (!%p1751_p11), %s1749_s8, 128, %s220_s10, %s209_s12  }
  0x4a   : > { %p1930_p10 = scmp.ne.s32.totalorder %s1925_s26, 0 }
  0x4b   : > { %s1772_s13 = sand.u32 (!%p1930_p10), 1, %s1592_s19   ;;  %p1931_p4 = scmp.ne.s32.totalorder (!%p1930_p10), %s1923_s24, 0 }
  0x4c   : > { %228 = sbr.rel (%p1930_p10) target bundleno = 1986 (0x7c2), region = 40  ;;  %s1239_s14 = sshll.u32 (!%p1930_p10), %s1772_s13, 3 }
  0x4d   : > { %s231_s16 = scalar_lea.sflag (!%p1930_p10), [#allocation3], %s1772_s13  ;;  %s234_s17 = scalar_lea.vmem (!%p1930_p10), [#allocation2], %s1239_s14 }
  0x51   : > { %1575 = dma.done.wait (%p1931_p4), %s231_s16, 128  }
  0x52   : > { %1577 = vsyncadd (%p1931_p4), %s231_s16, 4294967168  ;;  %p1932_p8 = scmp.eq.s32.totalorder %s1675_s22, 0 }
  0x54   : > { %1579 = dma.done.wait (%p1932_p8), [#allocation6], 1024   ;;  %p1933_p3 = pmov %p1932_p8 }
  0x55   : > { %v1607_v0 = vmov 0.0   ;;  %vm1608_vm0 = vmmov 0   ;;  %v273_v1 = vld [vmem:[#allocation5 + $0x18] sm:$0xff]  ;;  %v272_v2 = vld [vmem:[#allocation5 + $0x10] sm:$0xff]  ;;  %v271_v3 = vld [vmem:[#allocation5 + $0x8] sm:$0xff]  ;;  %vm281_vm1 = vcmask 261120   ;;  %v355_v16 = vlaneseq }
  0x56   : > { %1581 = vsyncadd (%p1933_p3), [#allocation6], 4294966272  ;;  %1289 = vmatprep.subr.mxu0 %v1607_v0  ;;  %1297 = vmatprep.mubr.msk.f32.mxu0 %vm1608_vm0, %v1607_v0  ;;  %v270_v4 = vld [vmem:[#allocation5] sm:$0xff]  ;;  %v269_v5 = vld [vmem:[%s234_s17] sm:$0xff]  ;;  %s1609_s8 = smov 64   ;;  %s1610_s10 = smov 96  }
  0x57   : > { %1300 = vmatprep.subr.mxu1 %v1607_v0  ;;  %1302 = vmatprep.mubr.msk.f32.mxu1 %vm1608_vm0, %v1607_v0  ;;  %v1243_v6 = vld [vmem:[%s1915_s2] ss:$0 sm:$0xff]  ;;  %s1611_s11 = smov 88   ;;  %s1612_s12 = smov 120   ;;  %vm364_vm2 = vcmask 64512   ;;  %v356_v17 = vshrl.u32 %v355_v16, 7 }
  0x58   : > { %1290 = vmatpush3.msra.mxu0 %v273_v1  ;;  %s1613_s30 = smov 80   ;;  %v358_v18 = vand.u32 127, %v355_v16  ;;  %s1614_s29 = smov 72   ;;  %vm1039_vm4 = vcmask 130048   ;;  %vm1041_vm5 = vcmask 195584  }
  0x59   : > { %1291 = vmatprep.subr.mxu0 %v1607_v0  ;;  %s1615_s6 = smov 112   ;;  %s1616_s28 = smov 104  }
  0x5a   : > { %1292 = vmatpush3.msra.mxu0 %v272_v2  ;;  %vm359_vm3 = vcmp.gt.s32.totalorder %v358_v18, %v356_v17  ;;  %s1617_s7 = smov 56   ;;  %s1618_s9 = smov 48  }
  0x5b   : > { %1293 = vmatprep.subr.mxu0 %v1607_v0  ;;  %s1619_s16 = smov 40   ;;  %s1620_s17 = smov 8  }
  0x5c   : > { %1294 = vmatpush3.msra.mxu0 %v271_v3  ;;  %s1621_s24 = smov 16   ;;  %s1622_s26 = smov 24  }
  0x5d   : > { %1295 = vmatprep.subr.mxu0 %v1607_v0  ;;  %p1934_p0 = scmp.ne.s32.totalorder %s1928_s23, 0 }
  0x5e   : > { %1296 = vmatpush3.msra.mxu0 %v270_v4 }
  0x5f   : > { %1298 = vmatmul.mubr.msk.f32.vlgmr.msra.gmra.mxu0 %vm281_vm1, %v269_v5  ;;  %1320 = vmatprep.subr.mxu0 %v1607_v0 }
  0x60   : > { %1322 = vmatprep.mubr.msk.f32.mxu0 %vm1608_vm0, %v1607_v0 }
 0x11f   : > { %v351_v7 = vpop.f32.mrf.mxu0 }
 0x120   : > { %v1802_v8 = vadd.f32 %v1243_v6, %v351_v7 }
 0x121   : > { %v1299_v9 = vpop.f32.mrf.mxu0 }
 0x122   : > { %452 = vrot.lane.b32.xlu1 %v1802_v8, %s1609_s8  ;;  %362 = vrot.lane.b32.xlu0 %v1802_v8, %s1610_s10  ;;  %v360_v10 = vmul.f32 0.35355338, %v1802_v8 }
 0x126   : > { %530 = vrot.lane.b32.xlu1 %v1802_v8, %s1611_s11  ;;  %s1260_s11 = sshll.u32 %s1675_s22, 7  ;;  %s1623_s22 = smov [#allocation8]  }
 0x12a   : > { %528 = vrot.lane.b32.xlu1 %v360_v10, %s1612_s12  ;;  %s268_s12 = scalar_lea.vmem [#allocation8], %s1239_s14  ;;  %s1536_s14 = sshll.u32 %s1623_s22, 4  ;;  %s1537_s14 = int_to_ptr.vmem [resolvable:$false] %s1536_s14 }
 0x12e   : > { %696 = vrot.lane.b32.xlu1 %v1802_v8, %s1613_s30  ;;  %s1142_s30 = sshll.u32 %s268_s12, 4  ;;  %s1143_s30 = int_to_ptr.vmem [resolvable:$true] %s1142_s30 }
 0x12f   : > { %p1539_p6 = scmp.lt.s32.totalorder %s1143_s30, %s1537_s14 }
 0x194   : > { %v453_v11 = vpop.permute.xlu1 %452  ;;  %v363_v12 = vpop.permute.xlu0 %362 }
 0x195   : > { %1301 = vmatpush3.xpose.msk.msra.mxu1 %vm364_vm2, %v363_v12  ;;  %v1046_v12 = vld [vmem:[#allocation7 + $0x18] sm:$0xff] }
 0x196   : > { %1305 = vmatprep.subr.mxu1 %v1607_v0 }
 0x198   : > { %v531_v13 = vpop.permute.xlu1 %530  ;;  %1303 = vmatmul.mubr.msk.f32.vlgmr.msra.gmra.mxu1 %vm364_vm2, %v360_v10 }
 0x199   : > { %1306 = vmatpush3.msra.mxu1 %v453_v11  ;;  %1307 = vmatprep.mubr.msk.f32.mxu1 %vm1608_vm0, %v1607_v0 }
 0x19a   : > { %1310 = vmatprep.subr.mxu1 %v1607_v0 }
 0x19c   : > { %v529_v14 = vpop.permute.xlu1 %528 }
 0x1a0   : > { %v697_v15 = vpop.permute.xlu1 %696 }
 0x1a1   : > { %1321 = vmatpush3.xpose.msk.msra.mxu0 %vm364_vm2, %v697_v15  ;;  %v1043_v15 = vld [vmem:[#allocation7] sm:$0xff] }
 0x1a2   : > { %1330 = vmatprep.subr.mxu0 %v1607_v0 }
 0x258   : > { %v436_v19 = vpop.f32.mrf.mxu1 }
 0x259   : > { %v440_v20 = vsel %vm359_vm3, -100000.0, %v436_v19 }
 0x25a   : > { %v1304_v21 = vpop.f32.mrf.mxu1  ;;  %v441_v22 = vsel %vm364_vm2, %v440_v20, -inf }
 0x25b   : > { %442 = vmax.xlane.f32.xlu0 %v441_v22 }
 0x271   : > { %862 = vrot.lane.b32.xlu0 %v1802_v8, %s1614_s29 }
 0x2e4   : > { %v443_v23 = vpop.xlane.xlu0 %442 }
 0x2e5   : > { %v444_v24 = vsub.f32 %v440_v20, %v443_v23 }
 0x2e7   : > { %v445_v25 = vmul.f32 1.442695, %v444_v24 }
 0x2e8   : > { %v863_v30 = vpop.permute.xlu0 %862 }
 0x2e9   : > { %1436 = vpow2.f32 %v445_v25 }
 0x2f6   : > { %v1437_v26 = vpop.eup %1436 }
 0x2f7   : > { %v447_v27 = vsel %vm364_vm2, %v1437_v26, 0.0 }
 0x2f8   : > { %448 = vadd.xlane.f32.xlu1 %v447_v27  ;;  %v1257_v27 = vld [vmem:[%s1917_s4] ss:$0 sm:$0xff] }
 0x309   : > { %694 = vrot.lane.b32.xlu1 %v360_v10, %s1615_s6 }
 0x30d   : > { %860 = vrot.lane.b32.xlu1 %v360_v10, %s1616_s28  ;;  %s1875_s28 = scalar_lea.hbm %s1918_s5, %s1260_s11 }
 0x381   : > { %v449_v28 = vpop.xlane.xlu1 %448 }
 0x382   : > { %1438 = vrcp.f32 %v449_v28 }
 0x385   : > { %v695_v29 = vpop.permute.xlu1 %694 }
 0x386   : > { %1323 = vmatmul.mubr.msk.f32.vlgmr.msra.gmra.mxu0 %vm364_vm2, %v695_v29 }
 0x387   : > { %1331 = vmatpush3.xpose.msk.msra.mxu0 %vm364_vm2, %v863_v30  ;;  %1332 = vmatprep.mubr.msk.f32.mxu0 %vm1608_vm0, %v1607_v0 }
 0x388   : > { %1340 = vmatprep.subr.mxu0 %v1607_v0 }
 0x389   : > { %v861_v31 = vpop.permute.xlu1 %860 }
 0x38a   : > { %1333 = vmatmul.mubr.msk.f32.vlgmr.msra.gmra.mxu0 %vm364_vm2, %v861_v31 }
 0x38b   : > { %1348 = vmatprep.mubr.msk.f32.mxu0 %vm1608_vm0, %v1607_v0  ;;  %1341 = vmatpush3.msra.mxu0 %v1046_v12 }
 0x38c   : > { %1342 = vmatprep.subr.mxu0 %v1607_v0 }
 0x38f   : > { %v1439_v32 = vpop.eup %1438 }
 0x390   : > { %v451_v33 = vmul.f32 %v1439_v32, %v1437_v26 }
 0x392   : > { %1308 = vmatmul.mubr.msk.f32.vlgmr.msra.gmra.mxu1 %vm364_vm2, %v451_v33 }
 0x393   : > { %1311 = vmatpush3.xpose.msk.msra.mxu1 %vm364_vm2, %v531_v13  ;;  %1312 = vmatprep.mubr.msk.f32.mxu1 %vm1608_vm0, %v1607_v0  ;;  %v1045_v13 = vld [vmem:[#allocation7 + $0x10] sm:$0xff] }
 0x394   : > { %1315 = vmatprep.subr.mxu1 %v1607_v0  ;;  %1343 = vmatpush3.msra.mxu0 %v1045_v13 }
 0x395   : > { %1344 = vmatprep.subr.mxu0 %v1607_v0 }
 0x396   : > { %1313 = vmatmul.mubr.msk.f32.vlgmr.msra.gmra.mxu1 %vm364_vm2, %v529_v14  ;;  %v1044_v14 = vld [vmem:[#allocation7 + $0x8] sm:$0xff] }
 0x397   : > { %1317 = vmatprep.mubr.msk.f32.mxu1 %vm1608_vm0, %v1607_v0  ;;  %1345 = vmatpush3.msra.mxu0 %v1044_v14 }
 0x398   : > { %1346 = vmatprep.subr.mxu0 %v1607_v0 }
 0x399   : > { %1347 = vmatpush3.msra.mxu0 %v1043_v15 }
 0x446   : > { %v768_v34 = vpop.f32.mrf.mxu0 }
 0x447   : > { %v772_v35 = vsel %vm359_vm3, -100000.0, %v768_v34 }
 0x448   : > { %v1324_v36 = vpop.f32.mrf.mxu0  ;;  %v773_v37 = vsel %vm364_vm2, %v772_v35, -inf }
 0x449   : > { %774 = vmax.xlane.f32.xlu0 %v773_v37 }
 0x44a   : > { %v934_v38 = vpop.f32.mrf.mxu0 }
 0x44b   : > { %v938_v46 = vsel %vm359_vm3, -100000.0, %v934_v38 }
 0x44c   : > { %v1334_v39 = vpop.f32.mrf.mxu0  ;;  %v939_v47 = vsel %vm364_vm2, %v938_v46, -inf }
 0x452   : > { %v1839_v40 = vpop.f32.mrf.mxu1 }
 0x454   : > { %v1309_v41 = vpop.f32.mrf.mxu1 }
 0x456   : > { %v602_v42 = vpop.f32.mrf.mxu1 }
 0x457   : > { %v606_v43 = vsel %vm359_vm3, -100000.0, %v602_v42 }
 0x458   : > { %v1314_v44 = vpop.f32.mrf.mxu1  ;;  %v607_v45 = vsel %vm364_vm2, %v606_v43, -inf }
 0x459   : > { %608 = vmax.xlane.f32.xlu1 %v607_v45 }
 0x45d   : > { %940 = vmax.xlane.f32.xlu1 %v939_v47 }
 0x4d2   : > { %v775_v48 = vpop.xlane.xlu0 %774 }
 0x4d3   : > { %v776_v49 = vsub.f32 %v772_v35, %v775_v48 }
 0x4d5   : > { %v777_v50 = vmul.f32 1.442695, %v776_v49 }
 0x4d7   : > { %1440 = vpow2.f32 %v777_v50 }
 0x4e2   : > { %v609_v51 = vpop.xlane.xlu1 %608 }
 0x4e3   : > { %v610_v59 = vsub.f32 %v606_v43, %v609_v51 }
 0x4e4   : > { %v1441_v52 = vpop.eup %1440 }
 0x4e5   : > { %v779_v53 = vsel %vm364_vm2, %v1441_v52, 0.0  ;;  %v611_v60 = vmul.f32 1.442695, %v610_v59 }
 0x4e6   : > { %780 = vadd.xlane.f32.xlu1 %v779_v53  ;;  %v941_v54 = vpop.xlane.xlu1 %940 }
 0x4e7   : > { %v942_v55 = vsub.f32 %v938_v46, %v941_v54 }
 0x4e9   : > { %v943_v56 = vmul.f32 1.442695, %v942_v55 }
 0x4eb   : > { %1442 = vpow2.f32 %v943_v56 }
 0x4ec   : > { %1444 = vpow2.f32 %v611_v60 }
 0x4f7   : > { %618 = vrot.lane.b32.xlu1 %v1802_v8, %s1617_s7  ;;  %s1129_s7 = scalar_lea.sflag [#allocation4], %s1772_s13 }
 0x4f8   : > { %v1443_v57 = vpop.eup %1442 }
 0x4f9   : > { %v945_v58 = vsel %vm364_vm2, %v1443_v57, 0.0  ;;  %v1445_v61 = vpop.eup %1444 }
 0x4fa   : > { %946 = vadd.xlane.f32.xlu0 %v945_v58  ;;  %v613_v62 = vsel %vm364_vm2, %v1445_v61, 0.0 }
 0x510   : > { %784 = vrot.lane.b32.xlu0 %v1802_v8, %s1618_s9  ;;  %s1532_s9 = scalar_lea.vmem %s1143_s30, 128 }
 0x511   : > { %p1533_p11 = scmp.ne.s32.totalorder %s1143_s30, %s1532_s9 }
 0x513   : > { %p1534_p1 = pnand %p1533_p11, %p1934_p0 }
 0x515   : > { %p1535_p2 = pneg %p1534_p1 }
 0x51b   : > { %614 = vadd.xlane.f32.xlu1 %v613_v62 }
 0x52c   : > { %950 = vrot.lane.b32.xlu1 %v1802_v8, %s1619_s16  ;;  %s1538_s16 = scalar_lea.vmem %s1537_s14, 256 }
 0x52d   : > { %p1540_p12 = scmp.lt.s32.totalorder %s1538_s16, %s1532_s9 }
 0x52f   : > { %p1541_p7 = por %p1540_p12, %p1539_p6 }
 0x531   : > { %p1542_p9 = pnand %p1541_p7, %p1535_p2 }
 0x56f   : > { %v781_v63 = vpop.xlane.xlu1 %780 }
 0x573   : > { %v619_v1 = vpop.permute.xlu1 %618 }
 0x574   : > { %1316 = vmatpush3.msra.mxu1 %v619_v1 }
 0x575   : > { %1325 = vmatprep.subr.mxu1 %v1607_v0 }
 0x583   : > { %v947_v3 = vpop.xlane.xlu0 %946 }
 0x587   : > { %v785_v7 = vpop.permute.xlu0 %784 }
 0x5a4   : > { %v615_v2 = vpop.xlane.xlu1 %614 }
 0x5a5   : > { %1446 = vrcp.f32 %v615_v2 }
 0x5a6   : > { %1448 = vrcp.f32 %v781_v63 }
 0x5a7   : > { %1450 = vrcp.f32 %v947_v3 }
 0x5a8   : > { %v951_v10 = vpop.permute.xlu1 %950 }
 0x5b2   : > { %v1447_v4 = vpop.eup %1446 }
 0x5b3   : > { %v617_v5 = vmul.f32 %v1447_v4, %v1445_v61  ;;  %v1449_v6 = vpop.eup %1448 }
 0x5b4   : > { %v783_v8 = vmul.f32 %v1449_v6, %v1441_v52  ;;  %v1451_v9 = vpop.eup %1450 }
 0x5b5   : > { %1318 = vmatmul.mubr.msk.f32.vlgmr.msra.gmra.mxu1 %vm364_vm2, %v617_v5  ;;  %v949_v11 = vmul.f32 %v1451_v9, %v1443_v57 }
 0x5b6   : > { %1326 = vmatpush3.msra.mxu1 %v785_v7  ;;  %1327 = vmatprep.mubr.msk.f32.mxu1 %vm1608_vm0, %v1607_v0 }
 0x5b7   : > { %1335 = vmatprep.subr.mxu1 %v1607_v0 }
 0x5b9   : > { %1328 = vmatmul.mubr.msk.f32.vlgmr.msra.gmra.mxu1 %vm364_vm2, %v783_v8 }
 0x5ba   : > { %1336 = vmatpush3.msra.mxu1 %v951_v10  ;;  %1337 = vmatprep.mubr.msk.f32.mxu1 %vm1608_vm0, %v1607_v0 }
 0x5bd   : > { %1338 = vmatmul.mubr.msk.f32.vlgmr.msra.gmra.mxu1 %vm364_vm2, %v949_v11 }
 0x675   : > { %v690_v16 = vpop.f32.mrf.mxu1 }
 0x676   : > { %1027 = vrot.lane.b32.xlu1 %v690_v16, %s1620_s17 }
 0x677   : > { %v1319_v17 = vpop.f32.mrf.mxu1 }
 0x679   : > { %v856_v18 = vpop.f32.mrf.mxu1 }
 0x67a   : > { %1031 = vrot.lane.b32.xlu0 %v856_v18, %s1621_s24 }
 0x67b   : > { %v1329_v19 = vpop.f32.mrf.mxu1 }
 0x67d   : > { %v1022_v20 = vpop.f32.mrf.mxu1 }
 0x67e   : > { %1035 = vrot.lane.b32.xlu1 %v1022_v20, %s1622_s26 }
 0x67f   : > { %v1339_v21 = vpop.f32.mrf.mxu1 }
 0x6e8   : > { %v1028_v22 = vpop.permute.xlu1 %1027 }
 0x6e9   : > { %v1038_v0 = vsel %vm364_vm2, %v1839_v40, %v1028_v22 }
 0x6ec   : > { %v1032_v23 = vpop.permute.xlu0 %1031 }
 0x6ed   : > { %v1040_v24 = vsel %vm1039_vm4, %v1038_v0, %v1032_v23 }
 0x6f0   : > { %v1036_v25 = vpop.permute.xlu1 %1035 }
 0x6f1   : > { %v1042_v26 = vsel %vm1041_vm5, %v1040_v24, %v1036_v25 }
 0x6f2   : > { %1349 = vmatmul.mubr.msk.f32.vlgmr.msra.gmra.mxu0 %vm281_vm1, %v1042_v26 }
 0x7b2   : > { %v1123_v28 = vpop.f32.mrf.mxu0 }
 0x7b3   : > { %v1124_v29 = vadd.f32 %v1257_v27, %v1123_v28 }
 0x7b4   : > { %v1350_v30 = vpop.f32.mrf.mxu0 }
 0x7b5   : > { %1127 = vst.msk [vmem:[%s268_s12] sm:$0xff] %vm281_vm1, %v1124_v29 }
 0x7b6   : > { %1545 = shalt.err (!%p1542_p9)
}
 0x7b7   : > { %s1546_s17 = scalar_lea.hbm %s1875_s28, 128  ;;  %s1550_s26 = scalar_lea.hbm %s1918_s5, 256 }
 0x7b8   : > { %p1547_p13 = scmp.ne.s32.totalorder %s1875_s28, %s1546_s17  ;;  %p1551_p4 = scmp.lt.s32.totalorder %s1875_s28, %s1918_s5 }
 0x7b9   : > { %p1552_p8 = scmp.lt.s32.totalorder %s1550_s26, %s1546_s17 }
 0x7ba   : > { %p1548_p5 = pnand %p1547_p13, %p1934_p0 }
 0x7bb   : > { %p1553_p3 = por %p1552_p8, %p1551_p4 }
 0x7bc   : > { %p1549_p10 = pneg %p1548_p5 }
 0x7be   : > { %p1554_p11 = pnand %p1553_p3, %p1549_p10 }
 0x7c0   : > { %1557 = shalt.err (!%p1554_p11)
}
 0x7c1   : > { %1361 = dma.vmem_to_hbm [thread:$0]  (%p1934_p0), %s1143_s30, 128, %s1875_s28, %s1129_s7  }
 0x7c2 PF: > { %s1154_s11 = sand.u32 1, %s1588_s18   ;;  %p1935_p1 = scmp.ne.s32.totalorder %s1924_s25, 0 }
 0x7c3   : > { %p1936_p2 = scmp.ge.s32.totalorder %s1600_s21, 2  ;;  %s1155_s12 = scalar_lea.sflag [#allocation4], %s1154_s11 }
 0x7c5   : > { %p1375_p6 = pnand %p1936_p2, %p1935_p1 }
 0x7c7   : > { %p1376_p12 = pneg %p1375_p6 }
 0x7c9   : > { %1583 = dma.done.wait (%p1376_p12), %s1155_s12, 128  }
 0x7ca   : > { %1585 = vsyncadd (%p1376_p12), %s1155_s12, 4294967168  ;;  %p19_p7 = scmp.ge.s32.totalorder %s1726_s15, 4   ;;  %s1937_s18 = smov %s1592_s19 }
 0x7cb   : > { %s1938_s19 = smov %s1596_s20  ;;  %s1939_s20 = smov %s1742_s27 }
 0x7cc   : > { %s1940_s21 = smov %s1726_s15  ;;  %21 = sbr.rel (!%p19_p7) target bundleno = 6 (0x6), region = 93 }
 0x7d1   :  { %1160 = vsyncpa [#allocation3], 1 }
 0x7d2   :  { %1162 = vsyncpa [#allocation3 + $0x1], 1 }
 0x7d3   :  { %1163 = vsyncpa [#allocation6], 1 }
 0x7d4   :  { %1164 = vsyncpa [#allocation4], 1 }
 0x7d5   :  { %1166 = vsyncpa [#allocation4 + $0x1], 1 }

</bundles_post_ra>
